<compile_context>
chip_gen: v7x
topology: tpu7x:2x2x1
jax: 0.10.0
libtpu: 0.0.40
codegen_flags: <defaults>
</compile_context>

<pallas_src>
import functools

import jax
import jax.numpy as jnp
from jax.experimental import pallas as pl
from jax.experimental.pallas import tpu as pltpu

EPS = 1e-5


def _round_up(x, m):
    return (x + m - 1) // m * m


# ------------------------------ fused kernel --------------------------------

def _fused_kernel(x_ref, w1_ref, w2_ref, wt_ref, bt_ref,
                  g1_ref, be1_ref, g2_ref, be2_ref,
                  m1_ref, m2_ref, o_ref, act_ref,
                  *, W, Cin, Cmid, NHW, n_valid1, n_valid2):
    Lpad = act_ref.shape[1]

    def conv3x3(src_ref, w_ref, c_in):
        # 3x3 VALID conv over the full (garbage-bordered) grid:
        # 9 accumulated channel matmuls over lane-shifted VMEM views.
        acc = None
        for kh in range(3):
            for kw in range(3):
                k = kh * 3 + kw
                wk = w_ref[:, k * c_in:(k + 1) * c_in]              # (Cout, c_in)
                xs = src_ref[:, kh * W + kw: kh * W + kw + NHW]     # (c_in, NHW)
                t = jnp.dot(wk, xs, preferred_element_type=jnp.float32)
                acc = t if acc is None else acc + t
        return acc                                                  # (Cout, NHW)

    def bn_relu(y, g_ref, b_ref, m_ref, cnt):
        # Training-mode batch stats over the VALID spatial positions only,
        # folded into a single per-channel scale/shift FMA + max.
        m = m_ref[...]                                              # (1, NHW)
        ym = y * m
        s = jnp.sum(ym, axis=1, keepdims=True)                      # (C, 1)
        sq = jnp.sum(ym * ym, axis=1, keepdims=True)                # (C, 1)
        inv_cnt = 1.0 / cnt
        mean = s * inv_cnt
        var = sq * inv_cnt - mean * mean                            # biased var
        scale = g_ref[...] * jax.lax.rsqrt(var + EPS)               # (C, 1)
        shift = b_ref[...] - mean * scale
        return jnp.maximum(y * scale + shift, 0.0)

    # conv1 (bias cancelled by BN) -> BN1 -> ReLU
    y1 = conv3x3(x_ref, w1_ref, Cin)
    a1 = bn_relu(y1, g1_ref, be1_ref, m1_ref, n_valid1)
    act_ref[:, 0:NHW] = a1
    act_ref[:, NHW:Lpad] = jnp.zeros((Cmid, Lpad - NHW), jnp.float32)

    # conv2 (bias cancelled by BN) -> BN2 -> ReLU
    y2 = conv3x3(act_ref, w2_ref, Cmid)
    a2 = bn_relu(y2, g2_ref, be2_ref, m2_ref, n_valid2)

    # ConvTranspose2d(k=2, s=2): non-overlapping -> single lane-dense matmul.
    o_ref[...] = (jnp.dot(wt_ref[...], a2, preferred_element_type=jnp.float32)
                  + bt_ref[...])


# --------------------------------- wrapper -----------------------------------

def conv_bn_relu_dw_forward(x_nchw, p):
    """Pallas implementation of _ConvBNReluDw.forward. Input/output are NCHW."""
    N, Cin, H, W = x_nchw.shape
    Cmid = p["w1"].shape[0]
    Cout = p["wt"].shape[1]
    Ho1, Wo1 = H - 2, W - 2          # after conv1
    Ho2, Wo2 = H - 4, W - 4          # after conv2
    NHW = N * H * W
    pad = _round_up(2 * W + 2, 128)  # room for the largest shifted view
    f32 = jnp.float32

    # Input: channels on sublanes, flattened full spatial grid on lanes.
    xp = jnp.transpose(x_nchw, (1, 0, 2, 3)).reshape(Cin, NHW).astype(f32)
    xp = jnp.pad(xp, ((0, 0), (0, pad)))                           # (Cin, NHW+pad)

    # 3x3 conv weights as (Cout, 9*Cin), column order (kh, kw, cin); no bias.
    w1 = jnp.transpose(p["w1"], (0, 2, 3, 1)).reshape(Cmid, 9 * Cin).astype(f32)
    w2 = jnp.transpose(p["w2"], (0, 2, 3, 1)).reshape(Cmid, 9 * Cmid).astype(f32)
    # ConvTranspose weight as (Cout*4, Cmid); row order (cout, kh, kw).
    wt = jnp.transpose(p["wt"], (1, 2, 3, 0)).reshape(Cout * 4, Cmid).astype(f32)
    bt = jnp.repeat(p["bt"].astype(f32), 4).reshape(Cout * 4, 1)

    g1 = p["g1"].reshape(Cmid, 1).astype(f32)
    be1 = p["be1"].reshape(Cmid, 1).astype(f32)
    g2 = p["g2"].reshape(Cmid, 1).astype(f32)
    be2 = p["be2"].reshape(Cmid, 1).astype(f32)

    def valid_mask(ho, wo):  # 1.0 at spatial positions that are real conv outputs
        v = (jnp.arange(H)[:, None] < ho) & (jnp.arange(W)[None, :] < wo)
        return jnp.broadcast_to(v[None], (N, H, W)).reshape(1, NHW).astype(f32)

    m1 = valid_mask(Ho1, Wo1)
    m2 = valid_mask(Ho2, Wo2)

    kernel = functools.partial(
        _fused_kernel, W=W, Cin=Cin, Cmid=Cmid, NHW=NHW,
        n_valid1=float(N * Ho1 * Wo1), n_valid2=float(N * Ho2 * Wo2))

    vmem = pl.BlockSpec(memory_space=pltpu.MemorySpace.VMEM)
    z = pl.pallas_call(
        kernel,
        out_shape=jax.ShapeDtypeStruct((Cout * 4, NHW), f32),
        in_specs=[vmem] * 11,
        out_specs=vmem,
        scratch_shapes=[pltpu.VMEM((Cmid, NHW + pad), f32)],
    )(xp, w1, w2, wt, bt, g1, be1, g2, be2, m1, m2)

    # Tiny epilogue: drop garbage border cols, interleave the 2x2 upsample,
    # land in NCHW.  (~32 KiB; pure slice/transpose/reshape.)
    z = z.reshape(Cout, 2, 2, N, H, W)[:, :, :, :, :Ho2, :Wo2]
    out = jnp.transpose(z, (3, 0, 4, 1, 5, 2)).reshape(N, Cout, 2 * Ho2, 2 * Wo2)
    return out


# ----------------------------- pure-JAX reference ----------------------------

def _ref_bn_relu_nchw(y, gamma, beta):
    mean = jnp.mean(y, axis=(0, 2, 3), keepdims=True)
    var = jnp.var(y, axis=(0, 2, 3), keepdims=True)
    yn = (y - mean) * jax.lax.rsqrt(var + EPS)
    yn = yn * gamma[None, :, None, None] + beta[None, :, None, None]
    return jnp.maximum(yn, 0.0)


def ref_forward(x_nchw, p):
    dn = ("NCHW", "OIHW", "NCHW")
    y = jax.lax.conv_general_dilated(x_nchw, p["w1"], (1, 1), "VALID",
                                     dimension_numbers=dn)
    y = y + p["b1"][None, :, None, None]
    y = _ref_bn_relu_nchw(y, p["g1"], p["be1"])
    y = jax.lax.conv_general_dilated(y, p["w2"], (1, 1), "VALID",
                                     dimension_numbers=dn)
    y = y + p["b2"][None, :, None, None]
    y = _ref_bn_relu_nchw(y, p["g2"], p["be2"])
    N, Ci, H, W = y.shape
    Co = p["wt"].shape[1]
    z = jnp.einsum("nihw,iojk->nohjwk", y, p["wt"]).reshape(N, Co, 2 * H, 2 * W)
    return z + p["bt"][None, :, None, None]


# ------------------------------------ main -----------------------------------

if __name__ == "__main__":
    key = jax.random.PRNGKey(0)
    kx, k1, k2, k3, k4, k5, k6, k7, k8, k9, k10 = jax.random.split(key, 11)

    in_ch, mid_ch, out_ch = 4, 8, 4
    x = jax.random.normal(kx, (2, in_ch, 16, 16), jnp.float32)

    params = {
        "w1": 0.1 * jax.random.normal(k1, (mid_ch, in_ch, 3, 3), jnp.float32),
        "b1": 0.1 * jax.random.normal(k2, (mid_ch,), jnp.float32),
        "g1": 1.0 + 0.1 * jax.random.normal(k3, (mid_ch,), jnp.float32),
        "be1": 0.1 * jax.random.normal(k4, (mid_ch,), jnp.float32),
        "w2": 0.1 * jax.random.normal(k5, (mid_ch, mid_ch, 3, 3), jnp.float32),
        "b2": 0.1 * jax.random.normal(k6, (mid_ch,), jnp.float32),
        "g2": 1.0 + 0.1 * jax.random.normal(k7, (mid_ch,), jnp.float32),
        "be2": 0.1 * jax.random.normal(k8, (mid_ch,), jnp.float32),
        "wt": 0.1 * jax.random.normal(k9, (mid_ch, out_ch, 2, 2), jnp.float32),
        "bt": 0.1 * jax.random.normal(k10, (out_ch,), jnp.float32),
    }

    fwd = jax.jit(conv_bn_relu_dw_forward)
    out = jax.block_until_ready(fwd(x, params))
    assert out.shape == (2, out_ch, 24, 24), out.shape

    ref = jax.block_until_ready(ref_forward(x, params))
    assert jnp.allclose(out, ref, atol=2e-3, rtol=2e-3), \
        float(jnp.max(jnp.abs(out - ref)))

    print("KERNEL_OK")
</pallas_src>

<mosaic_0001>
module attributes {stable_mosaic.version = 11 : i64} {
  func.func @_fused_kernel(%arg0: memref<4x640xf32, #tpu.memory_space<vmem>>, %arg1: memref<8x36xf32, #tpu.memory_space<vmem>>, %arg2: memref<8x72xf32, #tpu.memory_space<vmem>>, %arg3: memref<16x8xf32, #tpu.memory_space<vmem>>, %arg4: memref<16x1xf32, #tpu.memory_space<vmem>>, %arg5: memref<8x1xf32, #tpu.memory_space<vmem>>, %arg6: memref<8x1xf32, #tpu.memory_space<vmem>>, %arg7: memref<8x1xf32, #tpu.memory_space<vmem>>, %arg8: memref<8x1xf32, #tpu.memory_space<vmem>>, %arg9: memref<1x512xf32, #tpu.memory_space<vmem>>, %arg10: memref<1x512xf32, #tpu.memory_space<vmem>>, %arg11: memref<16x512xf32, #tpu.memory_space<vmem>>, %arg12: memref<8x640xf32, #tpu.memory_space<vmem>>) attributes {dimension_semantics = [], scalar_prefetch = 0 : i64, scratch_operands = 1 : i64, tpu.core_type = #tpu.core_type<tc>} {
    %c0 = arith.constant 0 : index
    %c0_0 = arith.constant 0 : index
    %0 = vector.load %arg1[%c0, %c0_0] : memref<8x36xf32, #tpu.memory_space<vmem>>, vector<8x4xf32>
    %c0_1 = arith.constant 0 : index
    %c0_2 = arith.constant 0 : index
    %1 = vector.load %arg0[%c0_1, %c0_2] : memref<4x640xf32, #tpu.memory_space<vmem>>, vector<4x512xf32>
    %cst = arith.constant dense<0.000000e+00> : vector<8x512xf32>
    %2 = tpu.matmul %0, %1, %cst {dimension_numbers = #tpu.dot_dimension_numbers<[1], [0], [0], [1], [0, 0, 1, 1], [], []>} : vector<8x4xf32>, vector<4x512xf32>, vector<8x512xf32> -> vector<8x512xf32>
    %c0_3 = arith.constant 0 : index
    %c4 = arith.constant 4 : index
    %3 = vector.load %arg1[%c0_3, %c4] : memref<8x36xf32, #tpu.memory_space<vmem>>, vector<8x4xf32>
    %c0_4 = arith.constant 0 : index
    %c1 = arith.constant 1 : index
    %4 = vector.load %arg0[%c0_4, %c1] : memref<4x640xf32, #tpu.memory_space<vmem>>, vector<4x512xf32>
    %cst_5 = arith.constant dense<0.000000e+00> : vector<8x512xf32>
    %5 = tpu.matmul %3, %4, %cst_5 {dimension_numbers = #tpu.dot_dimension_numbers<[1], [0], [0], [1], [0, 0, 1, 1], [], []>} : vector<8x4xf32>, vector<4x512xf32>, vector<8x512xf32> -> vector<8x512xf32>
    %6 = arith.addf %2, %5 : vector<8x512xf32>
    %c0_6 = arith.constant 0 : index
    %c8 = arith.constant 8 : index
    %7 = vector.load %arg1[%c0_6, %c8] : memref<8x36xf32, #tpu.memory_space<vmem>>, vector<8x4xf32>
    %c0_7 = arith.constant 0 : index
    %c2 = arith.constant 2 : index
    %8 = vector.load %arg0[%c0_7, %c2] : memref<4x640xf32, #tpu.memory_space<vmem>>, vector<4x512xf32>
    %cst_8 = arith.constant dense<0.000000e+00> : vector<8x512xf32>
    %9 = tpu.matmul %7, %8, %cst_8 {dimension_numbers = #tpu.dot_dimension_numbers<[1], [0], [0], [1], [0, 0, 1, 1], [], []>} : vector<8x4xf32>, vector<4x512xf32>, vector<8x512xf32> -> vector<8x512xf32>
    %10 = arith.addf %6, %9 : vector<8x512xf32>
    %c0_9 = arith.constant 0 : index
    %c12 = arith.constant 12 : index
    %11 = vector.load %arg1[%c0_9, %c12] : memref<8x36xf32, #tpu.memory_space<vmem>>, vector<8x4xf32>
    %c0_10 = arith.constant 0 : index
    %c16 = arith.constant 16 : index
    %12 = vector.load %arg0[%c0_10, %c16] : memref<4x640xf32, #tpu.memory_space<vmem>>, vector<4x512xf32>
    %cst_11 = arith.constant dense<0.000000e+00> : vector<8x512xf32>
    %13 = tpu.matmul %11, %12, %cst_11 {dimension_numbers = #tpu.dot_dimension_numbers<[1], [0], [0], [1], [0, 0, 1, 1], [], []>} : vector<8x4xf32>, vector<4x512xf32>, vector<8x512xf32> -> vector<8x512xf32>
    %14 = arith.addf %10, %13 : vector<8x512xf32>
    %c0_12 = arith.constant 0 : index
    %c16_13 = arith.constant 16 : index
    %15 = vector.load %arg1[%c0_12, %c16_13] : memref<8x36xf32, #tpu.memory_space<vmem>>, vector<8x4xf32>
    %c0_14 = arith.constant 0 : index
    %c17 = arith.constant 17 : index
    %16 = vector.load %arg0[%c0_14, %c17] : memref<4x640xf32, #tpu.memory_space<vmem>>, vector<4x512xf32>
    %cst_15 = arith.constant dense<0.000000e+00> : vector<8x512xf32>
    %17 = tpu.matmul %15, %16, %cst_15 {dimension_numbers = #tpu.dot_dimension_numbers<[1], [0], [0], [1], [0, 0, 1, 1], [], []>} : vector<8x4xf32>, vector<4x512xf32>, vector<8x512xf32> -> vector<8x512xf32>
    %18 = arith.addf %14, %17 : vector<8x512xf32>
    %c0_16 = arith.constant 0 : index
    %c20 = arith.constant 20 : index
    %19 = vector.load %arg1[%c0_16, %c20] : memref<8x36xf32, #tpu.memory_space<vmem>>, vector<8x4xf32>
    %c0_17 = arith.constant 0 : index
    %c18 = arith.constant 18 : index
    %20 = vector.load %arg0[%c0_17, %c18] : memref<4x640xf32, #tpu.memory_space<vmem>>, vector<4x512xf32>
    %cst_18 = arith.constant dense<0.000000e+00> : vector<8x512xf32>
    %21 = tpu.matmul %19, %20, %cst_18 {dimension_numbers = #tpu.dot_dimension_numbers<[1], [0], [0], [1], [0, 0, 1, 1], [], []>} : vector<8x4xf32>, vector<4x512xf32>, vector<8x512xf32> -> vector<8x512xf32>
    %22 = arith.addf %18, %21 : vector<8x512xf32>
    %c0_19 = arith.constant 0 : index
    %c24 = arith.constant 24 : index
    %23 = vector.load %arg1[%c0_19, %c24] : memref<8x36xf32, #tpu.memory_space<vmem>>, vector<8x4xf32>
    %c0_20 = arith.constant 0 : index
    %c32 = arith.constant 32 : index
    %24 = vector.load %arg0[%c0_20, %c32] : memref<4x640xf32, #tpu.memory_space<vmem>>, vector<4x512xf32>
    %cst_21 = arith.constant dense<0.000000e+00> : vector<8x512xf32>
    %25 = tpu.matmul %23, %24, %cst_21 {dimension_numbers = #tpu.dot_dimension_numbers<[1], [0], [0], [1], [0, 0, 1, 1], [], []>} : vector<8x4xf32>, vector<4x512xf32>, vector<8x512xf32> -> vector<8x512xf32>
    %26 = arith.addf %22, %25 : vector<8x512xf32>
    %c0_22 = arith.constant 0 : index
    %c28 = arith.constant 28 : index
    %27 = vector.load %arg1[%c0_22, %c28] : memref<8x36xf32, #tpu.memory_space<vmem>>, vector<8x4xf32>
    %c0_23 = arith.constant 0 : index
    %c33 = arith.constant 33 : index
    %28 = vector.load %arg0[%c0_23, %c33] : memref<4x640xf32, #tpu.memory_space<vmem>>, vector<4x512xf32>
    %cst_24 = arith.constant dense<0.000000e+00> : vector<8x512xf32>
    %29 = tpu.matmul %27, %28, %cst_24 {dimension_numbers = #tpu.dot_dimension_numbers<[1], [0], [0], [1], [0, 0, 1, 1], [], []>} : vector<8x4xf32>, vector<4x512xf32>, vector<8x512xf32> -> vector<8x512xf32>
    %30 = arith.addf %26, %29 : vector<8x512xf32>
    %c0_25 = arith.constant 0 : index
    %c32_26 = arith.constant 32 : index
    %31 = vector.load %arg1[%c0_25, %c32_26] : memref<8x36xf32, #tpu.memory_space<vmem>>, vector<8x4xf32>
    %c0_27 = arith.constant 0 : index
    %c34 = arith.constant 34 : index
    %32 = vector.load %arg0[%c0_27, %c34] : memref<4x640xf32, #tpu.memory_space<vmem>>, vector<4x512xf32>
    %cst_28 = arith.constant dense<0.000000e+00> : vector<8x512xf32>
    %33 = tpu.matmul %31, %32, %cst_28 {dimension_numbers = #tpu.dot_dimension_numbers<[1], [0], [0], [1], [0, 0, 1, 1], [], []>} : vector<8x4xf32>, vector<4x512xf32>, vector<8x512xf32> -> vector<8x512xf32>
    %34 = arith.addf %30, %33 : vector<8x512xf32>
    %c0_29 = arith.constant 0 : index
    %c0_30 = arith.constant 0 : index
    %35 = vector.load %arg9[%c0_29, %c0_30] : memref<1x512xf32, #tpu.memory_space<vmem>>, vector<1x512xf32>
    %36 = vector.broadcast %35 : vector<1x512xf32> to vector<8x512xf32>
    %37 = arith.mulf %34, %36 : vector<8x512xf32>
    %cst_31 = arith.constant dense<0.000000e+00> : vector<8xf32>
    %38 = vector.multi_reduction <add>, %37, %cst_31 [1] : vector<8x512xf32> to vector<8xf32>
    %39 = vector.shape_cast %38 : vector<8xf32> to vector<8x1xf32>
    %40 = arith.mulf %37, %37 : vector<8x512xf32>
    %cst_32 = arith.constant dense<0.000000e+00> : vector<8xf32>
    %41 = vector.multi_reduction <add>, %40, %cst_32 [1] : vector<8x512xf32> to vector<8xf32>
    %42 = vector.shape_cast %41 : vector<8xf32> to vector<8x1xf32>
    %cst_33 = arith.constant 0.00255102036 : f32
    %43 = vector.broadcast %cst_33 : f32 to vector<8x1xf32>
    %44 = arith.mulf %39, %43 : vector<8x1xf32>
    %cst_34 = arith.constant 0.00255102036 : f32
    %45 = vector.broadcast %cst_34 : f32 to vector<8x1xf32>
    %46 = arith.mulf %42, %45 : vector<8x1xf32>
    %47 = arith.mulf %44, %44 : vector<8x1xf32>
    %48 = arith.subf %46, %47 : vector<8x1xf32>
    %c0_35 = arith.constant 0 : index
    %c0_36 = arith.constant 0 : index
    %49 = vector.load %arg5[%c0_35, %c0_36] : memref<8x1xf32, #tpu.memory_space<vmem>>, vector<8x1xf32>
    %cst_37 = arith.constant 9.99999974E-6 : f32
    %50 = vector.broadcast %cst_37 : f32 to vector<8x1xf32>
    %51 = arith.addf %48, %50 : vector<8x1xf32>
    %52 = math.rsqrt %51 : vector<8x1xf32>
    %53 = arith.mulf %49, %52 : vector<8x1xf32>
    %c0_38 = arith.constant 0 : index
    %c0_39 = arith.constant 0 : index
    %54 = vector.load %arg6[%c0_38, %c0_39] : memref<8x1xf32, #tpu.memory_space<vmem>>, vector<8x1xf32>
    %55 = arith.mulf %44, %53 : vector<8x1xf32>
    %56 = arith.subf %54, %55 : vector<8x1xf32>
    %57 = vector.broadcast %53 : vector<8x1xf32> to vector<8x512xf32>
    %58 = arith.mulf %34, %57 : vector<8x512xf32>
    %59 = vector.broadcast %56 : vector<8x1xf32> to vector<8x512xf32>
    %60 = arith.addf %58, %59 : vector<8x512xf32>
    %cst_40 = arith.constant 0.000000e+00 : f32
    %61 = vector.broadcast %cst_40 : f32 to vector<8x512xf32>
    %62 = arith.maximumf %60, %61 : vector<8x512xf32>
    %c0_41 = arith.constant 0 : index
    %c0_42 = arith.constant 0 : index
    %63 = vector.load %arg12[%c0_41, %c0_42] : memref<8x640xf32, #tpu.memory_space<vmem>>, vector<8x512xf32>
    tpu.vector_store %arg12[%c0_41, %c0_42], %62 {strides = array<i32>} : memref<8x640xf32, #tpu.memory_space<vmem>>, vector<8x512xf32>,
    %cst_43 = arith.constant 0.000000e+00 : f32
    %64 = vector.broadcast %cst_43 : f32 to vector<8x128xf32>
    %c0_44 = arith.constant 0 : index
    %c512 = arith.constant 512 : index
    %65 = vector.load %arg12[%c0_44, %c512] : memref<8x640xf32, #tpu.memory_space<vmem>>, vector<8x128xf32>
    tpu.vector_store %arg12[%c0_44, %c512], %64 {strides = array<i32>} : memref<8x640xf32, #tpu.memory_space<vmem>>, vector<8x128xf32>,
    %c0_45 = arith.constant 0 : index
    %c0_46 = arith.constant 0 : index
    %66 = vector.load %arg2[%c0_45, %c0_46] : memref<8x72xf32, #tpu.memory_space<vmem>>, vector<8x8xf32>
    %c0_47 = arith.constant 0 : index
    %c0_48 = arith.constant 0 : index
    %67 = vector.load %arg12[%c0_47, %c0_48] : memref<8x640xf32, #tpu.memory_space<vmem>>, vector<8x512xf32>
    %cst_49 = arith.constant dense<0.000000e+00> : vector<8x512xf32>
    %68 = tpu.matmul %66, %67, %cst_49 {dimension_numbers = #tpu.dot_dimension_numbers<[1], [0], [0], [1], [0, 0, 1, 1], [], []>} : vector<8x8xf32>, vector<8x512xf32>, vector<8x512xf32> -> vector<8x512xf32>
    %c0_50 = arith.constant 0 : index
    %c8_51 = arith.constant 8 : index
    %69 = vector.load %arg2[%c0_50, %c8_51] : memref<8x72xf32, #tpu.memory_space<vmem>>, vector<8x8xf32>
    %c0_52 = arith.constant 0 : index
    %c1_53 = arith.constant 1 : index
    %70 = vector.load %arg12[%c0_52, %c1_53] : memref<8x640xf32, #tpu.memory_space<vmem>>, vector<8x512xf32>
    %cst_54 = arith.constant dense<0.000000e+00> : vector<8x512xf32>
    %71 = tpu.matmul %69, %70, %cst_54 {dimension_numbers = #tpu.dot_dimension_numbers<[1], [0], [0], [1], [0, 0, 1, 1], [], []>} : vector<8x8xf32>, vector<8x512xf32>, vector<8x512xf32> -> vector<8x512xf32>
    %72 = arith.addf %68, %71 : vector<8x512xf32>
    %c0_55 = arith.constant 0 : index
    %c16_56 = arith.constant 16 : index
    %73 = vector.load %arg2[%c0_55, %c16_56] : memref<8x72xf32, #tpu.memory_space<vmem>>, vector<8x8xf32>
    %c0_57 = arith.constant 0 : index
    %c2_58 = arith.constant 2 : index
    %74 = vector.load %arg12[%c0_57, %c2_58] : memref<8x640xf32, #tpu.memory_space<vmem>>, vector<8x512xf32>
    %cst_59 = arith.constant dense<0.000000e+00> : vector<8x512xf32>
    %75 = tpu.matmul %73, %74, %cst_59 {dimension_numbers = #tpu.dot_dimension_numbers<[1], [0], [0], [1], [0, 0, 1, 1], [], []>} : vector<8x8xf32>, vector<8x512xf32>, vector<8x512xf32> -> vector<8x512xf32>
    %76 = arith.addf %72, %75 : vector<8x512xf32>
    %c0_60 = arith.constant 0 : index
    %c24_61 = arith.constant 24 : index
    %77 = vector.load %arg2[%c0_60, %c24_61] : memref<8x72xf32, #tpu.memory_space<vmem>>, vector<8x8xf32>
    %c0_62 = arith.constant 0 : index
    %c16_63 = arith.constant 16 : index
    %78 = vector.load %arg12[%c0_62, %c16_63] : memref<8x640xf32, #tpu.memory_space<vmem>>, vector<8x512xf32>
    %cst_64 = arith.constant dense<0.000000e+00> : vector<8x512xf32>
    %79 = tpu.matmul %77, %78, %cst_64 {dimension_numbers = #tpu.dot_dimension_numbers<[1], [0], [0], [1], [0, 0, 1, 1], [], []>} : vector<8x8xf32>, vector<8x512xf32>, vector<8x512xf32> -> vector<8x512xf32>
    %80 = arith.addf %76, %79 : vector<8x512xf32>
    %c0_65 = arith.constant 0 : index
    %c32_66 = arith.constant 32 : index
    %81 = vector.load %arg2[%c0_65, %c32_66] : memref<8x72xf32, #tpu.memory_space<vmem>>, vector<8x8xf32>
    %c0_67 = arith.constant 0 : index
    %c17_68 = arith.constant 17 : index
    %82 = vector.load %arg12[%c0_67, %c17_68] : memref<8x640xf32, #tpu.memory_space<vmem>>, vector<8x512xf32>
    %cst_69 = arith.constant dense<0.000000e+00> : vector<8x512xf32>
    %83 = tpu.matmul %81, %82, %cst_69 {dimension_numbers = #tpu.dot_dimension_numbers<[1], [0], [0], [1], [0, 0, 1, 1], [], []>} : vector<8x8xf32>, vector<8x512xf32>, vector<8x512xf32> -> vector<8x512xf32>
    %84 = arith.addf %80, %83 : vector<8x512xf32>
    %c0_70 = arith.constant 0 : index
    %c40 = arith.constant 40 : index
    %85 = vector.load %arg2[%c0_70, %c40] : memref<8x72xf32, #tpu.memory_space<vmem>>, vector<8x8xf32>
    %c0_71 = arith.constant 0 : index
    %c18_72 = arith.constant 18 : index
    %86 = vector.load %arg12[%c0_71, %c18_72] : memref<8x640xf32, #tpu.memory_space<vmem>>, vector<8x512xf32>
    %cst_73 = arith.constant dense<0.000000e+00> : vector<8x512xf32>
    %87 = tpu.matmul %85, %86, %cst_73 {dimension_numbers = #tpu.dot_dimension_numbers<[1], [0], [0], [1], [0, 0, 1, 1], [], []>} : vector<8x8xf32>, vector<8x512xf32>, vector<8x512xf32> -> vector<8x512xf32>
    %88 = arith.addf %84, %87 : vector<8x512xf32>
    %c0_74 = arith.constant 0 : index
    %c48 = arith.constant 48 : index
    %89 = vector.load %arg2[%c0_74, %c48] : memref<8x72xf32, #tpu.memory_space<vmem>>, vector<8x8xf32>
    %c0_75 = arith.constant 0 : index
    %c32_76 = arith.constant 32 : index
    %90 = vector.load %arg12[%c0_75, %c32_76] : memref<8x640xf32, #tpu.memory_space<vmem>>, vector<8x512xf32>
    %cst_77 = arith.constant dense<0.000000e+00> : vector<8x512xf32>
    %91 = tpu.matmul %89, %90, %cst_77 {dimension_numbers = #tpu.dot_dimension_numbers<[1], [0], [0], [1], [0, 0, 1, 1], [], []>} : vector<8x8xf32>, vector<8x512xf32>, vector<8x512xf32> -> vector<8x512xf32>
    %92 = arith.addf %88, %91 : vector<8x512xf32>
    %c0_78 = arith.constant 0 : index
    %c56 = arith.constant 56 : index
    %93 = vector.load %arg2[%c0_78, %c56] : memref<8x72xf32, #tpu.memory_space<vmem>>, vector<8x8xf32>
    %c0_79 = arith.constant 0 : index
    %c33_80 = arith.constant 33 : index
    %94 = vector.load %arg12[%c0_79, %c33_80] : memref<8x640xf32, #tpu.memory_space<vmem>>, vector<8x512xf32>
    %cst_81 = arith.constant dense<0.000000e+00> : vector<8x512xf32>
    %95 = tpu.matmul %93, %94, %cst_81 {dimension_numbers = #tpu.dot_dimension_numbers<[1], [0], [0], [1], [0, 0, 1, 1], [], []>} : vector<8x8xf32>, vector<8x512xf32>, vector<8x512xf32> -> vector<8x512xf32>
    %96 = arith.addf %92, %95 : vector<8x512xf32>
    %c0_82 = arith.constant 0 : index
    %c64 = arith.constant 64 : index
    %97 = vector.load %arg2[%c0_82, %c64] : memref<8x72xf32, #tpu.memory_space<vmem>>, vector<8x8xf32>
    %c0_83 = arith.constant 0 : index
    %c34_84 = arith.constant 34 : index
    %98 = vector.load %arg12[%c0_83, %c34_84] : memref<8x640xf32, #tpu.memory_space<vmem>>, vector<8x512xf32>
    %cst_85 = arith.constant dense<0.000000e+00> : vector<8x512xf32>
    %99 = tpu.matmul %97, %98, %cst_85 {dimension_numbers = #tpu.dot_dimension_numbers<[1], [0], [0], [1], [0, 0, 1, 1], [], []>} : vector<8x8xf32>, vector<8x512xf32>, vector<8x512xf32> -> vector<8x512xf32>
    %100 = arith.addf %96, %99 : vector<8x512xf32>
    %c0_86 = arith.constant 0 : index
    %c0_87 = arith.constant 0 : index
    %101 = vector.load %arg10[%c0_86, %c0_87] : memref<1x512xf32, #tpu.memory_space<vmem>>, vector<1x512xf32>
    %102 = vector.broadcast %101 : vector<1x512xf32> to vector<8x512xf32>
    %103 = arith.mulf %100, %102 : vector<8x512xf32>
    %cst_88 = arith.constant dense<0.000000e+00> : vector<8xf32>
    %104 = vector.multi_reduction <add>, %103, %cst_88 [1] : vector<8x512xf32> to vector<8xf32>
    %105 = vector.shape_cast %104 : vector<8xf32> to vector<8x1xf32>
    %106 = arith.mulf %103, %103 : vector<8x512xf32>
    %cst_89 = arith.constant dense<0.000000e+00> : vector<8xf32>
    %107 = vector.multi_reduction <add>, %106, %cst_89 [1] : vector<8x512xf32> to vector<8xf32>
    %108 = vector.shape_cast %107 : vector<8xf32> to vector<8x1xf32>
    %cst_90 = arith.constant 0.00347222225 : f32
    %109 = vector.broadcast %cst_90 : f32 to vector<8x1xf32>
    %110 = arith.mulf %105, %109 : vector<8x1xf32>
    %cst_91 = arith.constant 0.00347222225 : f32
    %111 = vector.broadcast %cst_91 : f32 to vector<8x1xf32>
    %112 = arith.mulf %108, %111 : vector<8x1xf32>
    %113 = arith.mulf %110, %110 : vector<8x1xf32>
    %114 = arith.subf %112, %113 : vector<8x1xf32>
    %c0_92 = arith.constant 0 : index
    %c0_93 = arith.constant 0 : index
    %115 = vector.load %arg7[%c0_92, %c0_93] : memref<8x1xf32, #tpu.memory_space<vmem>>, vector<8x1xf32>
    %cst_94 = arith.constant 9.99999974E-6 : f32
    %116 = vector.broadcast %cst_94 : f32 to vector<8x1xf32>
    %117 = arith.addf %114, %116 : vector<8x1xf32>
    %118 = math.rsqrt %117 : vector<8x1xf32>
    %119 = arith.mulf %115, %118 : vector<8x1xf32>
    %c0_95 = arith.constant 0 : index
    %c0_96 = arith.constant 0 : index
    %120 = vector.load %arg8[%c0_95, %c0_96] : memref<8x1xf32, #tpu.memory_space<vmem>>, vector<8x1xf32>
    %121 = arith.mulf %110, %119 : vector<8x1xf32>
    %122 = arith.subf %120, %121 : vector<8x1xf32>
    %123 = vector.broadcast %119 : vector<8x1xf32> to vector<8x512xf32>
    %124 = arith.mulf %100, %123 : vector<8x512xf32>
    %125 = vector.broadcast %122 : vector<8x1xf32> to vector<8x512xf32>
    %126 = arith.addf %124, %125 : vector<8x512xf32>
    %cst_97 = arith.constant 0.000000e+00 : f32
    %127 = vector.broadcast %cst_97 : f32 to vector<8x512xf32>
    %128 = arith.maximumf %126, %127 : vector<8x512xf32>
    %c0_98 = arith.constant 0 : index
    %c0_99 = arith.constant 0 : index
    %129 = vector.load %arg3[%c0_98, %c0_99] : memref<16x8xf32, #tpu.memory_space<vmem>>, vector<16x8xf32>
    %cst_100 = arith.constant dense<0.000000e+00> : vector<16x512xf32>
    %130 = tpu.matmul %129, %128, %cst_100 {dimension_numbers = #tpu.dot_dimension_numbers<[1], [0], [0], [1], [0, 0, 1, 1], [], []>} : vector<16x8xf32>, vector<8x512xf32>, vector<16x512xf32> -> vector<16x512xf32>
    %c0_101 = arith.constant 0 : index
    %c0_102 = arith.constant 0 : index
    %131 = vector.load %arg4[%c0_101, %c0_102] : memref<16x1xf32, #tpu.memory_space<vmem>>, vector<16x1xf32>
    %132 = vector.broadcast %131 : vector<16x1xf32> to vector<16x512xf32>
    %133 = arith.addf %130, %132 : vector<16x512xf32>
    %c0_103 = arith.constant 0 : index
    %c0_104 = arith.constant 0 : index
    %134 = vector.load %arg11[%c0_103, %c0_104] : memref<16x512xf32, #tpu.memory_space<vmem>>, vector<16x512xf32>
    tpu.vector_store %arg11[%c0_103, %c0_104], %133 {strides = array<i32>} : memref<16x512xf32, #tpu.memory_space<vmem>>, vector<16x512xf32>,
    return
  }
}

</mosaic_0001>

<bundles_post_ra>
// kernel: conv_bn_relu_dw_forward.1
= control target key start
LH: loop header
LB: loop body
LE: loop exit
PB: predicated region body
PF: predicated region fallthrough
CT: control target
= control target key end

     0   :  { %v3664_v2 = vmov 0.0   ;;  %s3665_s21 = smov 127   ;;  %s3666_s24 = smov 124   ;;  %vm62_vm0 = vcmask 1039360   ;;  %vm70_vm1 = vcmask 1043456   ;;  %vm67_vm2 = vcmask 31744   ;;  %s4260_s0 = inlined_call_operand.vmem [shape: f32[4,640], index: 0, kind: input, shape index: {}]   ;;  %s4261_s1 = inlined_call_operand.vmem [shape: f32[8,36], index: 1, kind: input, shape index: {}]   ;;  %s4262_s9 = inlined_call_operand.vmem [shape: f32[1,512], index: 9, kind: input, shape index: {}]   ;;  %s4263_s5 = inlined_call_operand.vmem [shape: f32[8,1], index: 5, kind: input, shape index: {}]   ;;  %s4264_s6 = inlined_call_operand.vmem [shape: f32[8,1], index: 6, kind: input, shape index: {}]   ;;  %s4265_s2 = inlined_call_operand.vmem [shape: f32[8,72], index: 2, kind: input, shape index: {}]   ;;  %s4266_s10 = inlined_call_operand.vmem [shape: f32[1,512], index: 10, kind: input, shape index: {}]   ;;  %s4267_s7 = inlined_call_operand.vmem [shape: f32[8,1], index: 7, kind: input, shape index: {}]   ;;  %s4268_s8 = inlined_call_operand.vmem [shape: f32[8,1], index: 8, kind: input, shape index: {}]   ;;  %s4269_s4 = inlined_call_operand.vmem [shape: f32[16,1], index: 4, kind: input, shape index: {}]   ;;  %s4270_s3 = inlined_call_operand.vmem [shape: f32[16,8], index: 3, kind: input, shape index: {}]   ;;  %s4271_s11 = inlined_call_operand.vmem [shape: f32[16,512], index: 11, kind: output, shape index: {}]  }
   0x1   :  { %v3747_v0 = vld [vmem:[%s4260_s0 + $0x8] sm:$0xff]  ;;  %v3752_v1 = vld [vmem:[%s4260_s0] sm:$0xff]  ;;  %143 = vmatprep.mubr.f32.mxu0 %v3664_v2  ;;  %214 = vmatprep.mubr.f32.mxu1 %v3664_v2  ;;  %v43_v6 = vld [vmem:[%s4260_s0 + $0x10] sm:$0xf]  ;;  %s3668_s27 = smov 120   ;;  %s3669_s30 = smov 112  }
   0x2   :  { %56 = vrot.lane.b32.xlu0 %v3747_v0, %s3665_s21  ;;  %52 = vrot.lane.b32.xlu1 %v3752_v1, %s3665_s21  ;;  %v3762_v3 = vcombine.high %v3752_v1, %v3752_v1  ;;  %v3767_v4 = vld [vmem:[%s4261_s1] sm:$0xff]  ;;  %v3771_v5 = vcombine.high %v3747_v0, %v3747_v0  ;;  %s3667_s1 = smov 126   ;;  %v380_v7 = vld [vmem:[%s4260_s0 + $0x10] sm:$0xf]  ;;  %s3670_s12 = smov 116   ;;  %vm399_vm3 = vcmask 1031168  }
   0x3   :  { %v563_v8 = vld [vmem:[%s4260_s0 + $0x10] sm:$0xf]  ;;  %s3671_s15 = smov 111   ;;  %s3672_s18 = smov 110   ;;  %vm582_vm4 = vcmask 916480   ;;  %vm765_vm5 = vcmask 908288  }
   0x4   :  { %v746_v9 = vld [vmem:[%s4260_s0 + $0x10] sm:$0xf]  ;;  %s3673_s19 = smov 108   ;;  %s3674_s23 = smov 96   ;;  %vm948_vm6 = vcmask 900096   ;;  %vm1131_vm7 = vcmask 785408  }
   0x5   :  { %v929_v10 = vld [vmem:[%s4260_s0 + $0x10] sm:$0xf]  ;;  %s3676_s28 = smov 95   ;;  %s3677_s29 = smov 100   ;;  %vm1314_vm8 = vcmask 777216   ;;  %vm1497_vm9 = vcmask 769024  }
   0x6   :  { %45 = vrot.lane.b32.xlu1 %v3767_v4, %s3666_s24  ;;  %54 = vrot.lane.b32.xlu0 %v3762_v3, %s3665_s21  ;;  %s3675_s24 = smov 104   ;;  %v1112_v11 = vld [vmem:[%s4260_s0 + $0x10] sm:$0xf]  ;;  %s3678_s14 = smov 94   ;;  %vm1772_vm10 = vcmask 64512  }
   0x7   :  { %v1295_v12 = vld [vmem:[%s4260_s0 + $0x10] sm:$0xf] }
   0x8   :  { %v1478_v13 = vld [vmem:[%s4260_s0 + $0x10] sm:$0xf] }
   0xa   :  { %60 = vrot.lane.b32.xlu1 %v43_v6, %s3665_s21  ;;  %58 = vrot.lane.b32.xlu0 %v3771_v5, %s3665_s21 }
   0xe   :  { %393 = vrot.lane.b32.xlu1 %v3747_v0, %s3667_s1  ;;  %391 = vrot.lane.b32.xlu0 %v3762_v3, %s3667_s1 }
  0x12   :  { %382 = vrot.lane.b32.xlu1 %v3767_v4, %s3668_s27  ;;  %389 = vrot.lane.b32.xlu0 %v3752_v1, %s3667_s1 }
  0x16   :  { %397 = vrot.lane.b32.xlu1 %v380_v7, %s3667_s1  ;;  %395 = vrot.lane.b32.xlu0 %v3771_v5, %s3667_s1 }
  0x1a   :  { %576 = vrot.lane.b32.xlu1 %v3747_v0, %s3669_s30  ;;  %574 = vrot.lane.b32.xlu0 %v3762_v3, %s3669_s30 }
  0x1e   :  { %565 = vrot.lane.b32.xlu1 %v3767_v4, %s3670_s12  ;;  %572 = vrot.lane.b32.xlu0 %v3752_v1, %s3669_s30 }
  0x22   :  { %580 = vrot.lane.b32.xlu1 %v563_v8, %s3669_s30  ;;  %578 = vrot.lane.b32.xlu0 %v3771_v5, %s3669_s30 }
  0x26   :  { %759 = vrot.lane.b32.xlu1 %v3747_v0, %s3671_s15  ;;  %757 = vrot.lane.b32.xlu0 %v3762_v3, %s3671_s15 }
  0x2a   :  { %748 = vrot.lane.b32.xlu1 %v3767_v4, %s3669_s30  ;;  %755 = vrot.lane.b32.xlu0 %v3752_v1, %s3671_s15 }
  0x2e   :  { %763 = vrot.lane.b32.xlu1 %v746_v9, %s3671_s15  ;;  %761 = vrot.lane.b32.xlu0 %v3771_v5, %s3671_s15 }
  0x32   :  { %942 = vrot.lane.b32.xlu1 %v3747_v0, %s3672_s18  ;;  %940 = vrot.lane.b32.xlu0 %v3762_v3, %s3672_s18 }
  0x36   :  { %931 = vrot.lane.b32.xlu1 %v3767_v4, %s3673_s19  ;;  %938 = vrot.lane.b32.xlu0 %v3752_v1, %s3672_s18 }
  0x3a   :  { %946 = vrot.lane.b32.xlu1 %v929_v10, %s3672_s18  ;;  %944 = vrot.lane.b32.xlu0 %v3771_v5, %s3672_s18 }
  0x3e   :  { %1125 = vrot.lane.b32.xlu1 %v3747_v0, %s3674_s23  ;;  %1123 = vrot.lane.b32.xlu0 %v3762_v3, %s3674_s23 }
  0x42   :  { %1114 = vrot.lane.b32.xlu1 %v3767_v4, %s3675_s24  ;;  %1121 = vrot.lane.b32.xlu0 %v3752_v1, %s3674_s23 }
  0x46   :  { %1129 = vrot.lane.b32.xlu1 %v1112_v11, %s3674_s23  ;;  %1127 = vrot.lane.b32.xlu0 %v3771_v5, %s3674_s23 }
  0x4a   :  { %1308 = vrot.lane.b32.xlu1 %v3747_v0, %s3676_s28  ;;  %1306 = vrot.lane.b32.xlu0 %v3762_v3, %s3676_s28 }
  0x4e   :  { %1297 = vrot.lane.b32.xlu1 %v3767_v4, %s3677_s29  ;;  %1304 = vrot.lane.b32.xlu0 %v3752_v1, %s3676_s28 }
  0x52   :  { %1312 = vrot.lane.b32.xlu1 %v1295_v12, %s3676_s28  ;;  %1310 = vrot.lane.b32.xlu0 %v3771_v5, %s3676_s28 }
  0x56   :  { %1491 = vrot.lane.b32.xlu1 %v3747_v0, %s3678_s14  ;;  %1489 = vrot.lane.b32.xlu0 %v3762_v3, %s3678_s14 }
  0x5a   :  { %1480 = vrot.lane.b32.xlu1 %v3767_v4, %s3674_s23  ;;  %1487 = vrot.lane.b32.xlu0 %v3752_v1, %s3678_s14 }
  0x5e   :  { %1495 = vrot.lane.b32.xlu1 %v1478_v13, %s3678_s14  ;;  %1493 = vrot.lane.b32.xlu0 %v3771_v5, %s3678_s14 }
  0x74   :  { %v57_v14 = vpop.permute.xlu0 %56  ;;  %v53_v15 = vpop.permute.xlu1 %52 }
  0x78   :  { %v46_v16 = vpop.permute.xlu1 %45  ;;  %v55_v17 = vpop.permute.xlu0 %54 }
  0x79   :  { %v64_v18 = vsel %vm62_vm0, %v55_v17, %v57_v14  ;;  %v63_v19 = vsel %vm62_vm0, %v53_v15, %v55_v17 }
  0x7a   :  { %3496 = vmatprep.subr.msk.mxu0 %vm70_vm1, %v64_v18 }
  0x7b   :  { %3497 = vmatpush1.msk.msra.mxu0 %vm70_vm1, %v63_v19 }
  0x7c   :  { %v61_v20 = vpop.permute.xlu1 %60  ;;  %3498 = vmatmul.mubr.msk.f32.vlgmr.msra.gmra.mrb[0].mxu0 %vm67_vm2, %v46_v16  ;;  %v59_v21 = vpop.permute.xlu0 %58  ;;  %3502 = vmatprep.subr.msk.mxu0 %vm70_vm1, %v3762_v3 }
  0x7d   :  { %v66_v22 = vsel %vm62_vm0, %v59_v21, %v61_v20  ;;  %v65_v23 = vsel %vm62_vm0, %v57_v14, %v59_v21  ;;  %3503 = vmatpush1.msk.msra.mxu0 %vm70_vm1, %v3752_v1  ;;  %299 = vmatprep.mubr.f32.mxu0 %v3664_v2 }
  0x7e   :  { %3499 = vmatprep.subr.msk.mxu1 %vm70_vm1, %v66_v22 }
  0x7f   :  { %3500 = vmatpush1.msk.msra.mxu1 %vm70_vm1, %v65_v23 }
  0x80   :  { %v394_v24 = vpop.permute.xlu1 %393  ;;  %3501 = vmatmul.mubr.msk.f32.vlgmr.msra.gmra.mrb[0].mxu1 %vm67_vm2, %v46_v16  ;;  %v392_v25 = vpop.permute.xlu0 %391  ;;  %3505 = vmatprep.subr.msk.mxu1 %vm70_vm1, %v3771_v5 }
  0x81   :  { %v401_v26 = vsel %vm399_vm3, %v392_v25, %v394_v24  ;;  %3506 = vmatpush1.msk.msra.mxu1 %vm70_vm1, %v3747_v0  ;;  %370 = vmatprep.mubr.f32.mxu1 %v3664_v2 }
  0x82   :  { %3508 = vmatprep.subr.msk.mxu0 %vm70_vm1, %v401_v26 }
  0x84   :  { %v383_v27 = vpop.permute.xlu1 %382  ;;  %v390_v28 = vpop.permute.xlu0 %389  ;;  %3504 = vmatmul.mubr.msk.f32.vlgmr.msra.gmra.mrb[0].mxu0 %vm67_vm2, %v3767_v4 }
  0x85   :  { %v400_v29 = vsel %vm399_vm3, %v390_v28, %v392_v25  ;;  %478 = vmatprep.mubr.f32.mxu0 %v3664_v2 }
  0x86   :  { %3509 = vmatpush1.msk.msra.mxu0 %vm70_vm1, %v400_v29 }
  0x88   :  { %v398_v30 = vpop.permute.xlu1 %397  ;;  %v396_v31 = vpop.permute.xlu0 %395  ;;  %3507 = vmatmul.mubr.msk.f32.vlgmr.msra.gmra.mrb[0].mxu1 %vm67_vm2, %v3767_v4 }
  0x89   :  { %v402_v32 = vsel %vm399_vm3, %v394_v24, %v396_v31  ;;  %v403_v33 = vsel %vm399_vm3, %v396_v31, %v398_v30  ;;  %549 = vmatprep.mubr.f32.mxu1 %v3664_v2  ;;  %v1660_v31 = vlaneseq }
  0x8a   :  { %3511 = vmatprep.subr.msk.mxu1 %vm70_vm1, %v403_v33 }
  0x8b   :  { %3512 = vmatpush1.msk.msra.mxu1 %vm70_vm1, %v402_v32  ;;  %v3987_v32 = vshrl.u32 %v1660_v31, 7 }
  0x8c   :  { %v577_v34 = vpop.permute.xlu1 %576  ;;  %v575_v35 = vpop.permute.xlu0 %574  ;;  %3510 = vmatmul.mubr.msk.f32.vlgmr.msra.gmra.mrb[0].mxu0 %vm67_vm2, %v383_v27 }
  0x8d   :  { %v584_v36 = vsel %vm582_vm4, %v575_v35, %v577_v34  ;;  %661 = vmatprep.mubr.f32.mxu0 %v3664_v2  ;;  %v1662_v33 = vsub.s32 0, %v3987_v32 }
  0x8e   :  { %3514 = vmatprep.subr.msk.mxu0 %vm70_vm1, %v584_v36 }
  0x90   :  { %v566_v37 = vpop.permute.xlu1 %565  ;;  %v573_v38 = vpop.permute.xlu0 %572  ;;  %3513 = vmatmul.mubr.msk.f32.vlgmr.msra.gmra.mrb[0].mxu1 %vm67_vm2, %v383_v27 }
  0x91   :  { %v583_v39 = vsel %vm582_vm4, %v573_v38, %v575_v35  ;;  %732 = vmatprep.mubr.f32.mxu1 %v3664_v2  ;;  %v1666_v35 = vsub.s32 1, %v3987_v32  ;;  %v1670_v38 = vsub.s32 2, %v3987_v32 }
  0x92   :  { %3515 = vmatpush1.msk.msra.mxu0 %vm70_vm1, %v583_v39  ;;  %v1674_v39 = vsub.s32 3, %v3987_v32 }
  0x94   :  { %v581_v40 = vpop.permute.xlu1 %580  ;;  %v579_v41 = vpop.permute.xlu0 %578  ;;  %3516 = vmatmul.mubr.msk.f32.vlgmr.msra.gmra.mrb[0].mxu0 %vm67_vm2, %v566_v37 }
  0x95   :  { %v585_v42 = vsel %vm582_vm4, %v577_v34, %v579_v41  ;;  %v586_v43 = vsel %vm582_vm4, %v579_v41, %v581_v40  ;;  %844 = vmatprep.mubr.f32.mxu0 %v3664_v2  ;;  %v1658_v34 = vld [vmem:[%s4262_s9] sm:$0xf] }
  0x96   :  { %3517 = vmatprep.subr.msk.mxu1 %vm70_vm1, %v586_v43  ;;  %v1663_v36 = vrot.slane %v1658_v34, %v1662_v33 }
  0x97   :  { %3518 = vmatpush1.msk.msra.mxu1 %vm70_vm1, %v585_v42 }
  0x98   :  { %v760_v44 = vpop.permute.xlu1 %759  ;;  %v758_v45 = vpop.permute.xlu0 %757  ;;  %3519 = vmatmul.mubr.msk.f32.vlgmr.msra.gmra.mrb[0].mxu1 %vm67_vm2, %v566_v37  ;;  %v1667_v37 = vrot.slane %v1658_v34, %v1666_v35 }
  0x99   :  { %v767_v46 = vsel %vm765_vm5, %v758_v45, %v760_v44  ;;  %915 = vmatprep.mubr.f32.mxu1 %v3664_v2 }
  0x9a   :  { %3520 = vmatprep.subr.msk.mxu0 %vm70_vm1, %v767_v46  ;;  %v1675_v46 = vrot.slane %v1658_v34, %v1674_v39 }
  0x9c   :  { %v749_v47 = vpop.permute.xlu1 %748  ;;  %v756_v48 = vpop.permute.xlu0 %755 }
  0x9d   :  { %v766_v49 = vsel %vm765_vm5, %v756_v48, %v758_v45 }
  0x9e   :  { %3521 = vmatpush1.msk.msra.mxu0 %vm70_vm1, %v766_v49 }
  0x9f   :  { %3522 = vmatmul.mubr.msk.f32.vlgmr.msra.gmra.mrb[0].mxu0 %vm67_vm2, %v749_v47 }
  0xa0   :  { %v764_v50 = vpop.permute.xlu1 %763  ;;  %v762_v51 = vpop.permute.xlu0 %761  ;;  %1027 = vmatprep.mubr.f32.mxu0 %v3664_v2 }
  0xa1   :  { %v768_v52 = vsel %vm765_vm5, %v760_v44, %v762_v51  ;;  %v769_v53 = vsel %vm765_vm5, %v762_v51, %v764_v50  ;;  %v1671_v44 = vrot.slane %v1658_v34, %v1670_v38 }
  0xa2   :  { %3523 = vmatprep.subr.msk.mxu1 %vm70_vm1, %v769_v53 }
  0xa3   :  { %3524 = vmatpush1.msk.msra.mxu1 %vm70_vm1, %v768_v52 }
  0xa4   :  { %v943_v54 = vpop.permute.xlu1 %942  ;;  %v941_v55 = vpop.permute.xlu0 %940  ;;  %3525 = vmatmul.mubr.msk.f32.vlgmr.msra.gmra.mrb[0].mxu1 %vm67_vm2, %v749_v47 }
  0xa5   :  { %v950_v56 = vsel %vm948_vm6, %v941_v55, %v943_v54  ;;  %1098 = vmatprep.mubr.f32.mxu1 %v3664_v2 }
  0xa6   :  { %3526 = vmatprep.subr.msk.mxu0 %vm70_vm1, %v950_v56 }
  0xa8   :  { %v932_v57 = vpop.permute.xlu1 %931  ;;  %v939_v58 = vpop.permute.xlu0 %938 }
  0xa9   :  { %v949_v59 = vsel %vm948_vm6, %v939_v58, %v941_v55 }
  0xaa   :  { %3527 = vmatpush1.msk.msra.mxu0 %vm70_vm1, %v949_v59 }
  0xab   :  { %3528 = vmatmul.mubr.msk.f32.vlgmr.msra.gmra.mrb[0].mxu0 %vm67_vm2, %v932_v57 }
  0xac   :  { %v947_v60 = vpop.permute.xlu1 %946  ;;  %v945_v61 = vpop.permute.xlu0 %944  ;;  %1210 = vmatprep.mubr.f32.mxu0 %v3664_v2 }
  0xad   :  { %v951_v62 = vsel %vm948_vm6, %v943_v54, %v945_v61  ;;  %v952_v63 = vsel %vm948_vm6, %v945_v61, %v947_v60  ;;  %v3679_v60 = vmov 0  }
  0xae   :  { %3529 = vmatprep.subr.msk.mxu1 %vm70_vm1, %v952_v63  ;;  %3656 = vset.pattern.permute.xlu0 %v3679_v60 }
  0xaf   :  { %3530 = vmatpush1.msk.msra.mxu1 %vm70_vm1, %v951_v62  ;;  %3657 = vset.pattern.permute.xlu1 %v3679_v60 }
  0xb0   :  { %v1126_v0 = vpop.permute.xlu1 %1125  ;;  %v1124_v1 = vpop.permute.xlu0 %1123  ;;  %3531 = vmatmul.mubr.msk.f32.vlgmr.msra.gmra.mrb[0].mxu1 %vm67_vm2, %v932_v57 }
  0xb1   :  { %v1133_v3 = vsel %vm1131_vm7, %v1124_v1, %v1126_v0  ;;  %1281 = vmatprep.mubr.f32.mxu1 %v3664_v2 }
  0xb2   :  { %3532 = vmatprep.subr.msk.mxu0 %vm70_vm1, %v1133_v3 }
  0xb4   :  { %v1115_v4 = vpop.permute.xlu1 %1114  ;;  %v1122_v5 = vpop.permute.xlu0 %1121 }
  0xb5   :  { %v1132_v6 = vsel %vm1131_vm7, %v1122_v5, %v1124_v1  ;;  %v1702_v5 = vld [vmem:[%s4263_s5] sm:$0xff]  ;;  %s3681_s5 = smov 80  }
  0xb6   :  { %3533 = vmatpush1.msk.msra.mxu0 %vm70_vm1, %v1132_v6 }
  0xb7   :  { %3534 = vmatmul.mubr.msk.f32.vlgmr.msra.gmra.mrb[0].mxu0 %vm67_vm2, %v1115_v4 }
  0xb8   :  { %v1130_v7 = vpop.permute.xlu1 %1129  ;;  %v1128_v8 = vpop.permute.xlu0 %1127  ;;  %1393 = vmatprep.mubr.f32.mxu0 %v3664_v2 }
  0xb9   :  { %v1134_v9 = vsel %vm1131_vm7, %v1126_v0, %v1128_v8  ;;  %v1135_v10 = vsel %vm1131_vm7, %v1128_v8, %v1130_v7  ;;  %v1706_v8 = vld [vmem:[%s4264_s6] sm:$0xff]  ;;  %s3682_s6 = smov 72  }
  0xba   :  { %3535 = vmatprep.subr.msk.mxu1 %vm70_vm1, %v1135_v10 }
  0xbb   :  { %3536 = vmatpush1.msk.msra.mxu1 %vm70_vm1, %v1134_v9 }
  0xbc   :  { %v1309_v11 = vpop.permute.xlu1 %1308  ;;  %v1307_v12 = vpop.permute.xlu0 %1306  ;;  %3537 = vmatmul.mubr.msk.f32.vlgmr.msra.gmra.mrb[0].mxu1 %vm67_vm2, %v1115_v4 }
  0xbd   :  { %v1316_v13 = vsel %vm1314_vm8, %v1307_v12, %v1309_v11  ;;  %1464 = vmatprep.mubr.f32.mxu1 %v3664_v2 }
  0xbe   :  { %3538 = vmatprep.subr.msk.mxu0 %vm70_vm1, %v1316_v13 }
  0xc0   :  { %v1298_v14 = vpop.permute.xlu1 %1297  ;;  %v1305_v15 = vpop.permute.xlu0 %1304 }
  0xc1   :  { %v1315_v16 = vsel %vm1314_vm8, %v1305_v15, %v1307_v12 }
  0xc2   :  { %3539 = vmatpush1.msk.msra.mxu0 %vm70_vm1, %v1315_v16 }
  0xc3   :  { %3540 = vmatmul.mubr.msk.f32.vlgmr.msra.gmra.mrb[0].mxu0 %vm67_vm2, %v1298_v14 }
  0xc4   :  { %v1313_v17 = vpop.permute.xlu1 %1312  ;;  %v1311_v18 = vpop.permute.xlu0 %1310  ;;  %1576 = vmatprep.mubr.f32.mxu0 %v3664_v2 }
  0xc5   :  { %v1317_v19 = vsel %vm1314_vm8, %v1309_v11, %v1311_v18  ;;  %v1318_v20 = vsel %vm1314_vm8, %v1311_v18, %v1313_v17  ;;  %v4013_v11 = vld [vmem:[%s4265_s2] sm:$0xff]  ;;  %s3680_s2 = smov 88  }
  0xc6   :  { %3541 = vmatprep.subr.msk.mxu1 %vm70_vm1, %v1318_v20 }
  0xc7   :  { %3542 = vmatpush1.msk.msra.mxu1 %vm70_vm1, %v1317_v19 }
  0xc8   :  { %v1492_v21 = vpop.permute.xlu1 %1491  ;;  %v1490_v22 = vpop.permute.xlu0 %1489  ;;  %3543 = vmatmul.mubr.msk.f32.vlgmr.msra.gmra.mrb[0].mxu1 %vm67_vm2, %v1298_v14 }
  0xc9   :  { %v1499_v23 = vsel %vm1497_vm9, %v1490_v22, %v1492_v21  ;;  %1647 = vmatprep.mubr.f32.mxu1 %v3664_v2 }
  0xca   :  { %3544 = vmatprep.subr.msk.mxu0 %vm70_vm1, %v1499_v23 }
  0xcc   :  { %v1481_v24 = vpop.permute.xlu1 %1480  ;;  %v1488_v25 = vpop.permute.xlu0 %1487 }
  0xcd   :  { %v1498_v26 = vsel %vm1497_vm9, %v1488_v25, %v1490_v22 }
  0xce   :  { %3545 = vmatpush1.msk.msra.mxu0 %vm70_vm1, %v1498_v26 }
  0xcf   :  { %3546 = vmatmul.mubr.msk.f32.vlgmr.msra.gmra.mrb[0].mxu0 %vm67_vm2, %v1481_v24 }
  0xd0   :  { %v1496_v27 = vpop.permute.xlu1 %1495  ;;  %v1494_v28 = vpop.permute.xlu0 %1493  ;;  %1839 = vmatprep.mubr.f32.mxu0 %v3664_v2 }
  0xd1   :  { %v1500_v29 = vsel %vm1497_vm9, %v1492_v21, %v1494_v28  ;;  %v1501_v30 = vsel %vm1497_vm9, %v1494_v28, %v1496_v27 }
  0xd2   :  { %3547 = vmatprep.subr.msk.mxu1 %vm70_vm1, %v1501_v30 }
  0xd3   :  { %3548 = vmatpush1.msk.msra.mxu1 %vm70_vm1, %v1500_v29 }
  0xd4   :  { %3549 = vmatmul.mubr.msk.f32.vlgmr.msra.gmra.mrb[0].mxu1 %vm67_vm2, %v1481_v24 }
  0xd5   :  { %1910 = vmatprep.mubr.f32.mxu1 %v3664_v2 }
 0x1a2   :  { %v1578_v40 = vpop.f32.mrb[0].mxu0 }
 0x1a3   :  { %v1680_v41 = vmul.f32 %v1663_v36, %v1578_v40  ;;  %v1580_v42 = vpop.f32.mrb[1].mxu0 }
 0x1a4   :  { %v1681_v43 = vmul.f32 %v1667_v37, %v1580_v42 }
 0x1a5   :  { %v1689_v45 = vmul.f32 %v1680_v41, %v1680_v41 }
 0x1a6   :  { %v1684_v47 = vadd.f32 %v1681_v43, %v1680_v41  ;;  %v1690_v48 = vmul.f32 %v1681_v43, %v1681_v43 }
 0x1a7   :  { %v1649_v49 = vpop.f32.mrb[0].mxu1 }
 0x1a8   :  { %v1682_v50 = vmul.f32 %v1671_v44, %v1649_v49  ;;  %v1651_v51 = vpop.f32.mrb[1].mxu1  ;;  %v1693_v52 = vadd.f32 %v1690_v48, %v1689_v45 }
 0x1a9   :  { %v1683_v53 = vmul.f32 %v1675_v46, %v1651_v51 }
 0x1aa   :  { %v1691_v54 = vmul.f32 %v1682_v50, %v1682_v50  ;;  %v1685_v55 = vadd.f32 %v1684_v47, %v1682_v50 }
 0x1ab   :  { %v1692_v56 = vmul.f32 %v1683_v53, %v1683_v53 }
 0x1ac   :  { %v1686_v57 = vadd.f32 %v1685_v55, %v1683_v53  ;;  %v1694_v58 = vadd.f32 %v1693_v52, %v1691_v54 }
 0x1ae   :  { %1687 = vadd.xlane.f32.xlu0 %v1686_v57  ;;  %v1695_v59 = vadd.f32 %v1694_v58, %v1692_v56 }
 0x1b0   :  { %1696 = vadd.xlane.f32.xlu1 %v1695_v59 }
 0x23b   :  { %v1688_v61 = vpop.xlane.xlu0 %1687 }
 0x23c   :  { %v1698_v62 = vmul.f32 0.0025510204, %v1688_v61 }
 0x23d   :  { %v1697_v63 = vpop.xlane.xlu1 %1696 }
 0x23e   :  { %v1700_v0 = vmul.f32 %v1698_v62, %v1698_v62  ;;  %v1699_v1 = vmul.f32 0.0025510204, %v1697_v63 }
 0x240   :  { %v1701_v3 = vsub.f32 %v1699_v1, %v1700_v0 }
 0x242   :  { %v1703_v4 = vadd.f32 1e-05, %v1701_v3 }
 0x244   :  { %3660 = vrsqrt.f32 %v1703_v4 }
 0x24e   :  { %v3661_v6 = vpop.eup %3660 }
 0x24f   :  { %v1705_v7 = vmul.f32 %v3661_v6, %v1702_v5 }
 0x251   :  { %1711 = vperm.xlu0 %3656, %v1705_v7   ;;  %v1707_v9 = vmul.f32 %v1705_v7, %v1698_v62 }
 0x253   :  { %v1708_v10 = vsub.f32 %v1706_v8, %v1707_v9 }
 0x255   :  { %1720 = vperm.xlu1 %3657, %v1708_v10  }
 0x259   :  { %1747 = vrot.lane.b32.xlu1 %v4013_v11, %s3668_s27 }
 0x25d   :  { %1762 = vrot.lane.b32.xlu1 %v3664_v2, %s3665_s21 }
 0x261   :  { %2061 = vrot.lane.b32.xlu1 %v4013_v11, %s3669_s30 }
 0x265   :  { %2071 = vrot.lane.b32.xlu1 %v3664_v2, %s3667_s1 }
 0x269   :  { %2229 = vrot.lane.b32.xlu1 %v4013_v11, %s3675_s24 }
 0x26d   :  { %2239 = vrot.lane.b32.xlu1 %v3664_v2, %s3669_s30 }
 0x271   :  { %2397 = vrot.lane.b32.xlu1 %v4013_v11, %s3674_s23 }
 0x2d0   :  { %v1712_v12 = vpop.permute.xlu0 %1711 }
 0x2d1   :  { %v1715_v13 = vmul.f32 %v1712_v12, %v1580_v42  ;;  %v1714_v15 = vmul.f32 %v1712_v12, %v1578_v40  ;;  %v1716_v16 = vmul.f32 %v1712_v12, %v1649_v49  ;;  %v1717_v21 = vmul.f32 %v1712_v12, %v1651_v51 }
 0x2d4   :  { %v1721_v14 = vpop.permute.xlu1 %1720 }
 0x2d5   :  { %v1724_v17 = vadd.f32 %v1721_v14, %v1715_v13  ;;  %v1723_v18 = vadd.f32 %v1721_v14, %v1714_v15  ;;  %v1725_v19 = vadd.f32 %v1721_v14, %v1716_v16  ;;  %v1726_v22 = vadd.f32 %v1721_v14, %v1717_v21 }
 0x2d7   :  { %v4029_v20 = vmax.f32 %v1724_v17, 0.0  ;;  %v4035_v23 = vmax.f32 %v1723_v18, 0.0  ;;  %v4037_v24 = vmax.f32 %v1725_v19, 0.0  ;;  %v4043_v25 = vmax.f32 %v1726_v22, 0.0 }
 0x2d8   :  { %v1748_v26 = vpop.permute.xlu1 %1747 }
 0x2d9   :  { %2065 = vrot.lane.b32.xlu0 %v4029_v20, %s3667_s1  ;;  %1756 = vrot.lane.b32.xlu1 %v4029_v20, %s3665_s21 }
 0x2dc   :  { %v1763_v27 = vpop.permute.xlu1 %1762 }
 0x2dd   :  { %1758 = vrot.lane.b32.xlu1 %v4037_v24, %s3665_s21  ;;  %2063 = vrot.lane.b32.xlu0 %v4035_v23, %s3667_s1 }
 0x2e0   :  { %v2062_v28 = vpop.permute.xlu1 %2061 }
 0x2e1   :  { %2069 = vrot.lane.b32.xlu0 %v4043_v25, %s3667_s1  ;;  %1754 = vrot.lane.b32.xlu1 %v4035_v23, %s3665_s21 }
 0x2e4   :  { %v2072_v29 = vpop.permute.xlu1 %2071 }
 0x2e5   :  { %2233 = vrot.lane.b32.xlu0 %v4029_v20, %s3669_s30  ;;  %1760 = vrot.lane.b32.xlu1 %v4043_v25, %s3665_s21  ;;  %s3683_s21 = smov 64  }
 0x2e8   :  { %v4115_v30 = vpop.permute.xlu1 %2229 }
 0x2e9   :  { %2231 = vrot.lane.b32.xlu0 %v4035_v23, %s3669_s30  ;;  %2407 = vrot.lane.b32.xlu1 %v3664_v2, %s3671_s15 }
 0x2ec   :  { %v2240_v31 = vpop.permute.xlu1 %2239 }
 0x2ed   :  { %2237 = vrot.lane.b32.xlu0 %v4043_v25, %s3669_s30  ;;  %2565 = vrot.lane.b32.xlu1 %v4013_v11, %s3680_s2 }
 0x2f0   :  { %v4117_v34 = vpop.permute.xlu1 %2397 }
 0x2f1   :  { %2401 = vrot.lane.b32.xlu0 %v4029_v20, %s3671_s15  ;;  %2067 = vrot.lane.b32.xlu1 %v4037_v24, %s3667_s1 }
 0x2f5   :  { %2399 = vrot.lane.b32.xlu0 %v4035_v23, %s3671_s15  ;;  %2575 = vrot.lane.b32.xlu1 %v3664_v2, %s3672_s18 }
 0x2f9   :  { %2405 = vrot.lane.b32.xlu0 %v4043_v25, %s3671_s15  ;;  %2235 = vrot.lane.b32.xlu1 %v4037_v24, %s3669_s30 }
 0x2fd   :  { %2569 = vrot.lane.b32.xlu0 %v4029_v20, %s3672_s18  ;;  %2733 = vrot.lane.b32.xlu1 %v4013_v11, %s3681_s5 }
 0x301   :  { %2567 = vrot.lane.b32.xlu0 %v4035_v23, %s3672_s18  ;;  %2403 = vrot.lane.b32.xlu1 %v4037_v24, %s3671_s15 }
 0x305   :  { %2573 = vrot.lane.b32.xlu0 %v4043_v25, %s3672_s18  ;;  %2743 = vrot.lane.b32.xlu1 %v3664_v2, %s3674_s23 }
 0x309   :  { %2737 = vrot.lane.b32.xlu0 %v4029_v20, %s3674_s23  ;;  %2571 = vrot.lane.b32.xlu1 %v4037_v24, %s3672_s18 }
 0x30d   :  { %2735 = vrot.lane.b32.xlu0 %v4035_v23, %s3674_s23  ;;  %2901 = vrot.lane.b32.xlu1 %v4013_v11, %s3682_s6 }
 0x311   :  { %2741 = vrot.lane.b32.xlu0 %v4043_v25, %s3674_s23  ;;  %2739 = vrot.lane.b32.xlu1 %v4037_v24, %s3674_s23 }
 0x315   :  { %2905 = vrot.lane.b32.xlu0 %v4029_v20, %s3676_s28  ;;  %2911 = vrot.lane.b32.xlu1 %v3664_v2, %s3676_s28 }
 0x319   :  { %2903 = vrot.lane.b32.xlu0 %v4035_v23, %s3676_s28  ;;  %2907 = vrot.lane.b32.xlu1 %v4037_v24, %s3676_s28 }
 0x31d   :  { %2909 = vrot.lane.b32.xlu0 %v4043_v25, %s3676_s28  ;;  %3069 = vrot.lane.b32.xlu1 %v4013_v11, %s3683_s21 }
 0x321   :  { %3073 = vrot.lane.b32.xlu0 %v4029_v20, %s3678_s14  ;;  %3075 = vrot.lane.b32.xlu1 %v4037_v24, %s3678_s14 }
 0x325   :  { %3071 = vrot.lane.b32.xlu0 %v4035_v23, %s3678_s14  ;;  %3079 = vrot.lane.b32.xlu1 %v3664_v2, %s3678_s14 }
 0x329   :  { %3077 = vrot.lane.b32.xlu0 %v4043_v25, %s3678_s14 }
 0x34b   :  { %v2066_v36 = vpop.permute.xlu0 %2065  ;;  %v1757_v37 = vpop.permute.xlu1 %1756 }
 0x34f   :  { %v2064_v40 = vpop.permute.xlu0 %2063  ;;  %v1759_v41 = vpop.permute.xlu1 %1758 }
 0x350   :  { %v1765_v42 = vsel %vm62_vm0, %v1757_v37, %v1759_v41  ;;  %v2073_v59 = vsel %vm399_vm3, %v2064_v40, %v2066_v36 }
 0x351   :  { %1775 = vmatprep.subr.mxu0 %v1765_v42 }
 0x353   :  { %v2070_v43 = vpop.permute.xlu0 %2069  ;;  %v1755_v44 = vpop.permute.xlu1 %1754 }
 0x354   :  { %v1764_v45 = vsel %vm62_vm0, %v1755_v44, %v1757_v37  ;;  %v2076_v52 = vsel %vm399_vm3, %v2070_v43, %v2072_v29 }
 0x355   :  { %1776 = vmatpush1.msra.mxu0 %v1764_v45 }
 0x356   :  { %3550 = vmatmul.mubr.msk.f32.vlgmr.msra.gmra.mrb[2].mxu0 %vm1772_vm10, %v1748_v26  ;;  %1919 = vmatprep.subr.mxu0 %v4029_v20 }
 0x357   :  { %v2234_v46 = vpop.permute.xlu0 %2233  ;;  %1920 = vmatpush1.msra.mxu0 %v4035_v23  ;;  %v1761_v47 = vpop.permute.xlu1 %1760  ;;  %1983 = vmatprep.mubr.f32.mxu0 %v3664_v2 }
 0x358   :  { %v1766_v48 = vsel %vm62_vm0, %v1759_v41, %v1761_v47  ;;  %v1767_v49 = vsel %vm62_vm0, %v1761_v47, %v1763_v27 }
 0x359   :  { %1846 = vmatprep.subr.mxu1 %v1767_v49 }
 0x35a   :  { %1847 = vmatpush1.msra.mxu1 %v1766_v48 }
 0x35b   :  { %v2232_v50 = vpop.permute.xlu0 %2231  ;;  %3551 = vmatmul.mubr.msk.f32.vlgmr.msra.gmra.mrb[2].mxu1 %vm1772_vm10, %v1748_v26  ;;  %1990 = vmatprep.subr.mxu1 %v4043_v25  ;;  %v2408_v51 = vpop.permute.xlu1 %2407 }
 0x35c   :  { %1991 = vmatpush1.msra.mxu1 %v4037_v24  ;;  %2054 = vmatprep.mubr.f32.mxu1 %v3664_v2  ;;  %v2241_v5 = vsel %vm582_vm4, %v2232_v50, %v2234_v46 }
 0x35d   :  { %2154 = vmatprep.subr.mxu1 %v2076_v52 }
 0x35e   :  { %3552 = vmatmul.mubr.msk.f32.vlgmr.msra.gmra.mrb[2].mxu0 %vm1772_vm10, %v4013_v11 }
 0x35f   :  { %v2238_v53 = vpop.permute.xlu0 %2237  ;;  %v4134_v54 = vpop.permute.xlu1 %2565  ;;  %2147 = vmatprep.mubr.f32.mxu0 %v3664_v2 }
 0x360   :  { %v2244_v60 = vsel %vm582_vm4, %v2238_v53, %v2240_v31 }
 0x363   :  { %v2402_v55 = vpop.permute.xlu0 %2401  ;;  %3553 = vmatmul.mubr.msk.f32.vlgmr.msra.gmra.mrb[2].mxu1 %vm1772_vm10, %v4013_v11  ;;  %v2068_v56 = vpop.permute.xlu1 %2067 }
 0x364   :  { %v2075_v57 = vsel %vm399_vm3, %v2068_v56, %v2070_v43  ;;  %v2074_v58 = vsel %vm399_vm3, %v2066_v36, %v2068_v56  ;;  %2218 = vmatprep.mubr.f32.mxu1 %v3664_v2 }
 0x365   :  { %2083 = vmatprep.subr.mxu0 %v2074_v58  ;;  %2155 = vmatpush1.msra.mxu1 %v2075_v57 }
 0x366   :  { %2084 = vmatpush1.msra.mxu0 %v2073_v59  ;;  %2322 = vmatprep.subr.mxu1 %v2244_v60 }
 0x367   :  { %v2400_v61 = vpop.permute.xlu0 %2399  ;;  %3554 = vmatmul.mubr.msk.f32.vlgmr.msra.gmra.mrb[2].mxu0 %vm1772_vm10, %v2062_v28  ;;  %v2576_v62 = vpop.permute.xlu1 %2575 }
 0x368   :  { %2315 = vmatprep.mubr.f32.mxu0 %v3664_v2  ;;  %v2409_v12 = vsel %vm765_vm5, %v2400_v61, %v2402_v55 }
 0x36b   :  { %v2406_v63 = vpop.permute.xlu0 %2405  ;;  %3555 = vmatmul.mubr.msk.f32.vlgmr.msra.gmra.mrb[2].mxu1 %vm1772_vm10, %v2062_v28  ;;  %v2236_v0 = vpop.permute.xlu1 %2235 }
 0x36c   :  { %v2243_v1 = vsel %vm582_vm4, %v2236_v0, %v2238_v53  ;;  %v2242_v3 = vsel %vm582_vm4, %v2234_v46, %v2236_v0  ;;  %v2412_v4 = vsel %vm765_vm5, %v2406_v63, %v2408_v51  ;;  %2386 = vmatprep.mubr.f32.mxu1 %v3664_v2  ;;  %v3237_v53 = vld [vmem:[%s4266_s10] sm:$0xf] }
 0x36d   :  { %2251 = vmatprep.subr.mxu0 %v2242_v3  ;;  %2323 = vmatpush1.msra.mxu1 %v2243_v1  ;;  %v3250_v60 = vrot.slane %v3237_v53, %v1670_v38 }
 0x36e   :  { %2252 = vmatpush1.msra.mxu0 %v2241_v5  ;;  %2490 = vmatprep.subr.mxu1 %v2412_v4 }
 0x36f   :  { %v2570_v6 = vpop.permute.xlu0 %2569  ;;  %3556 = vmatmul.mubr.msk.f32.vlgmr.msra.gmra.mrb[2].mxu0 %vm1772_vm10, %v4115_v30  ;;  %v2734_v7 = vpop.permute.xlu1 %2733 }
 0x370   :  { %2483 = vmatprep.mubr.f32.mxu0 %v3664_v2 }
 0x373   :  { %v2568_v8 = vpop.permute.xlu0 %2567  ;;  %3557 = vmatmul.mubr.msk.f32.vlgmr.msra.gmra.mrb[2].mxu1 %vm1772_vm10, %v4115_v30  ;;  %v2404_v9 = vpop.permute.xlu1 %2403 }
 0x374   :  { %v2411_v10 = vsel %vm765_vm5, %v2404_v9, %v2406_v63  ;;  %v2410_v11 = vsel %vm765_vm5, %v2402_v55, %v2404_v9  ;;  %2554 = vmatprep.mubr.f32.mxu1 %v3664_v2  ;;  %v2577_v20 = vsel %vm948_vm6, %v2568_v8, %v2570_v6  ;;  %v3246_v55 = vrot.slane %v3237_v53, %v1666_v35 }
 0x375   :  { %2419 = vmatprep.subr.mxu0 %v2410_v11  ;;  %2491 = vmatpush1.msra.mxu1 %v2411_v10 }
 0x376   :  { %2420 = vmatpush1.msra.mxu0 %v2409_v12 }
 0x377   :  { %v2574_v13 = vpop.permute.xlu0 %2573  ;;  %3558 = vmatmul.mubr.msk.f32.vlgmr.msra.gmra.mrb[2].mxu0 %vm1772_vm10, %v4117_v34  ;;  %v2744_v14 = vpop.permute.xlu1 %2743 }
 0x378   :  { %v2580_v15 = vsel %vm948_vm6, %v2574_v13, %v2576_v62  ;;  %2651 = vmatprep.mubr.f32.mxu0 %v3664_v2  ;;  %v3254_v62 = vrot.slane %v3237_v53, %v1674_v39 }
 0x379   :  { %2658 = vmatprep.subr.mxu1 %v2580_v15  ;;  %v3281_v15 = vld [vmem:[%s4267_s7] sm:$0xff] }
 0x37b   :  { %v2738_v16 = vpop.permute.xlu0 %2737  ;;  %3559 = vmatmul.mubr.msk.f32.vlgmr.msra.gmra.mrb[2].mxu1 %vm1772_vm10, %v4117_v34  ;;  %v2572_v17 = vpop.permute.xlu1 %2571 }
 0x37c   :  { %v2579_v18 = vsel %vm948_vm6, %v2572_v17, %v2574_v13  ;;  %v2578_v19 = vsel %vm948_vm6, %v2570_v6, %v2572_v17  ;;  %2722 = vmatprep.mubr.f32.mxu1 %v3664_v2 }
 0x37d   :  { %2587 = vmatprep.subr.mxu0 %v2578_v19  ;;  %2659 = vmatpush1.msra.mxu1 %v2579_v18  ;;  %v3285_v18 = vld [vmem:[%s4268_s8] sm:$0xff] }
 0x37e   :  { %2588 = vmatpush1.msra.mxu0 %v2577_v20  ;;  %v3312_v20 = vld [vmem:[%s4269_s4] sm:$0xff] }
 0x37f   :  { %v2736_v21 = vpop.permute.xlu0 %2735  ;;  %3560 = vmatmul.mubr.msk.f32.vlgmr.msra.gmra.mrb[2].mxu0 %vm1772_vm10, %v4134_v54  ;;  %v2902_v22 = vpop.permute.xlu1 %2901 }
 0x380   :  { %2819 = vmatprep.mubr.f32.mxu0 %v3664_v2  ;;  %v2745_v28 = vsel %vm1131_vm7, %v2736_v21, %v2738_v16 }
 0x383   :  { %v2742_v23 = vpop.permute.xlu0 %2741  ;;  %3561 = vmatmul.mubr.msk.f32.vlgmr.msra.gmra.mrb[2].mxu1 %vm1772_vm10, %v4134_v54  ;;  %v2740_v24 = vpop.permute.xlu1 %2739  ;;  %v3242_v54 = vrot.slane %v3237_v53, %v1662_v33 }
 0x384   :  { %v2747_v25 = vsel %vm1131_vm7, %v2740_v24, %v2742_v23  ;;  %v2746_v26 = vsel %vm1131_vm7, %v2738_v16, %v2740_v24  ;;  %v2748_v27 = vsel %vm1131_vm7, %v2742_v23, %v2744_v14  ;;  %2890 = vmatprep.mubr.f32.mxu1 %v3664_v2 }
 0x385   :  { %2755 = vmatprep.subr.mxu0 %v2746_v26  ;;  %2826 = vmatprep.subr.mxu1 %v2748_v27 }
 0x386   :  { %2756 = vmatpush1.msra.mxu0 %v2745_v28  ;;  %2827 = vmatpush1.msra.mxu1 %v2747_v25 }
 0x387   :  { %v2906_v29 = vpop.permute.xlu0 %2905  ;;  %3562 = vmatmul.mubr.msk.f32.vlgmr.msra.gmra.mrb[2].mxu0 %vm1772_vm10, %v2734_v7  ;;  %v2912_v30 = vpop.permute.xlu1 %2911 }
 0x388   :  { %2987 = vmatprep.mubr.f32.mxu0 %v3664_v2 }
 0x38b   :  { %v2904_v31 = vpop.permute.xlu0 %2903  ;;  %3563 = vmatmul.mubr.msk.f32.vlgmr.msra.gmra.mrb[2].mxu1 %vm1772_vm10, %v2734_v7  ;;  %v2908_v34 = vpop.permute.xlu1 %2907 }
 0x38c   :  { %v2913_v36 = vsel %vm1314_vm8, %v2904_v31, %v2906_v29  ;;  %v2914_v37 = vsel %vm1314_vm8, %v2906_v29, %v2908_v34  ;;  %3058 = vmatprep.mubr.f32.mxu1 %v3664_v2 }
 0x38d   :  { %2923 = vmatprep.subr.mxu0 %v2914_v37 }
 0x38e   :  { %2924 = vmatpush1.msra.mxu0 %v2913_v36 }
 0x38f   :  { %v2910_v40 = vpop.permute.xlu0 %2909  ;;  %3564 = vmatmul.mubr.msk.f32.vlgmr.msra.gmra.mrb[2].mxu0 %vm1772_vm10, %v2902_v22  ;;  %v3070_v41 = vpop.permute.xlu1 %3069 }
 0x390   :  { %v2915_v42 = vsel %vm1314_vm8, %v2908_v34, %v2910_v40  ;;  %v2916_v43 = vsel %vm1314_vm8, %v2910_v40, %v2912_v30  ;;  %3155 = vmatprep.mubr.f32.mxu0 %v3664_v2 }
 0x391   :  { %2994 = vmatprep.subr.mxu1 %v2916_v43  ;;  %v3311_v43 = vld [vmem:[%s4270_s3 + $0x8] sm:$0xff] }
 0x392   :  { %2995 = vmatpush1.msra.mxu1 %v2915_v42  ;;  %v3310_v42 = vld [vmem:[%s4270_s3] sm:$0xff] }
 0x393   :  { %v3074_v44 = vpop.permute.xlu0 %3073  ;;  %3565 = vmatmul.mubr.msk.f32.vlgmr.msra.gmra.mrb[2].mxu1 %vm1772_vm10, %v2902_v22  ;;  %v3076_v45 = vpop.permute.xlu1 %3075  ;;  %v3313_v22 = vld [vmem:[%s4269_s4 + $0x8] sm:$0xff] }
 0x394   :  { %v3082_v46 = vsel %vm1497_vm9, %v3074_v44, %v3076_v45  ;;  %3226 = vmatprep.mubr.f32.mxu1 %v3664_v2 }
 0x395   :  { %3091 = vmatprep.subr.mxu0 %v3082_v46 }
 0x397   :  { %v3072_v47 = vpop.permute.xlu0 %3071  ;;  %v3080_v49 = vpop.permute.xlu1 %3079 }
 0x398   :  { %v3081_v48 = vsel %vm1497_vm9, %v3072_v47, %v3074_v44 }
 0x399   :  { %3092 = vmatpush1.msra.mxu0 %v3081_v48 }
 0x39a   :  { %3566 = vmatmul.mubr.msk.f32.vlgmr.msra.gmra.mrb[2].mxu0 %vm1772_vm10, %v3070_v41 }
 0x39b   :  { %v3078_v50 = vpop.permute.xlu0 %3077  ;;  %3394 = vmatprep.mubr.f32.mxu0 %v3664_v2 }
 0x39c   :  { %v3083_v51 = vsel %vm1497_vm9, %v3076_v45, %v3078_v50  ;;  %v3084_v52 = vsel %vm1497_vm9, %v3078_v50, %v3080_v49 }
 0x39d   :  { %3162 = vmatprep.subr.mxu1 %v3084_v52 }
 0x39e   :  { %3163 = vmatpush1.msra.mxu1 %v3083_v51 }
 0x39f   :  { %3567 = vmatmul.mubr.msk.f32.vlgmr.msra.gmra.mrb[2].mxu1 %vm1772_vm10, %v3070_v41 }
 0x3a0   :  { %3471 = vmatprep.mubr.f32.mxu1 %v3664_v2 }
 0x46d   :  { %v3157_v56 = vpop.f32.mrb[2].mxu0 }
 0x46e   :  { %v3259_v57 = vmul.f32 %v3242_v54, %v3157_v56  ;;  %v3159_v58 = vpop.f32.mrb[3].mxu0 }
 0x46f   :  { %v3260_v59 = vmul.f32 %v3246_v55, %v3159_v58 }
 0x470   :  { %v3268_v61 = vmul.f32 %v3259_v57, %v3259_v57 }
 0x471   :  { %v3263_v63 = vadd.f32 %v3260_v59, %v3259_v57  ;;  %v3269_v0 = vmul.f32 %v3260_v59, %v3260_v59 }
 0x472   :  { %v3228_v1 = vpop.f32.mrb[2].mxu1 }
 0x473   :  { %v3272_v3 = vadd.f32 %v3269_v0, %v3268_v61  ;;  %v3261_v4 = vmul.f32 %v3250_v60, %v3228_v1  ;;  %v3230_v33 = vpop.f32.mrb[3].mxu1 }
 0x474   :  { %v3262_v5 = vmul.f32 %v3254_v62, %v3230_v33 }
 0x475   :  { %v3270_v6 = vmul.f32 %v3261_v4, %v3261_v4  ;;  %v3264_v35 = vadd.f32 %v3263_v63, %v3261_v4 }
 0x476   :  { %v3271_v7 = vmul.f32 %v3262_v5, %v3262_v5 }
 0x477   :  { %v3273_v8 = vadd.f32 %v3272_v3, %v3270_v6  ;;  %v3265_v9 = vadd.f32 %v3264_v35, %v3262_v5 }
 0x479   :  { %3266 = vadd.xlane.f32.xlu0 %v3265_v9  ;;  %v3274_v10 = vadd.f32 %v3273_v8, %v3271_v7 }
 0x47b   :  { %3275 = vadd.xlane.f32.xlu1 %v3274_v10 }
 0x506   :  { %v3267_v38 = vpop.xlane.xlu0 %3266 }
 0x507   :  { %v3277_v11 = vmul.f32 0.0034722222, %v3267_v38 }
 0x508   :  { %v3276_v12 = vpop.xlane.xlu1 %3275 }
 0x509   :  { %v3279_v32 = vmul.f32 %v3277_v11, %v3277_v11  ;;  %v3278_v39 = vmul.f32 0.0034722222, %v3276_v12 }
 0x50b   :  { %v3280_v13 = vsub.f32 %v3278_v39, %v3279_v32 }
 0x50d   :  { %v3282_v14 = vadd.f32 1e-05, %v3280_v13 }
 0x50f   :  { %3662 = vrsqrt.f32 %v3282_v14 }
 0x519   :  { %v3663_v16 = vpop.eup %3662 }
 0x51a   :  { %v3284_v17 = vmul.f32 %v3663_v16, %v3281_v15 }
 0x51c   :  { %3290 = vperm.xlu0 %3656, %v3284_v17   ;;  %v3286_v19 = vmul.f32 %v3284_v17, %v3277_v11 }
 0x51e   :  { %v3287_v21 = vsub.f32 %v3285_v18, %v3286_v19 }
 0x520   :  { %3316 = vperm.xlu0 %3656, %v3312_v20   ;;  %3299 = vperm.xlu1 %3657, %v3287_v21  }
 0x524   :  { %3321 = vperm.xlu1 %3657, %v3313_v22  }
 0x59b   :  { %v3291_v23 = vpop.permute.xlu0 %3290 }
 0x59c   :  { %v3293_v24 = vmul.f32 %v3291_v23, %v3157_v56  ;;  %v3294_v25 = vmul.f32 %v3291_v23, %v3159_v58  ;;  %v3295_v26 = vmul.f32 %v3291_v23, %v3228_v1  ;;  %v3296_v27 = vmul.f32 %v3291_v23, %v3230_v33 }
 0x59f   :  { %v3300_v28 = vpop.permute.xlu1 %3299  ;;  %v3317_v44 = vpop.permute.xlu0 %3316 }
 0x5a0   :  { %v3302_v29 = vadd.f32 %v3300_v28, %v3293_v24  ;;  %v3304_v30 = vadd.f32 %v3300_v28, %v3295_v26  ;;  %v3303_v31 = vadd.f32 %v3300_v28, %v3294_v25  ;;  %v3305_v34 = vadd.f32 %v3300_v28, %v3296_v27 }
 0x5a2   :  { %v3306_v36 = vmax.f32 %v3302_v29, 0.0  ;;  %v3308_v37 = vmax.f32 %v3304_v30, 0.0  ;;  %v3307_v40 = vmax.f32 %v3303_v31, 0.0  ;;  %v3309_v41 = vmax.f32 %v3305_v34, 0.0 }
 0x5a3   :  { %v3322_v53 = vpop.permute.xlu1 %3321 }
 0x5a4   :  { %3330 = vmatprep.subr.mxu0 %v3307_v40  ;;  %3407 = vmatprep.subr.mxu1 %v3309_v41 }
 0x5a5   :  { %3331 = vmatpush1.msra.mxu0 %v3306_v36  ;;  %3408 = vmatpush1.msra.mxu1 %v3308_v37 }
 0x5a6   :  { %3568 = vmatmul.mubr.msk.f32.vlgmr.msra.gmra.mrb[4].mxu0 %vm1772_vm10, %v3310_v42  ;;  %3570 = vmatmul.mubr.msk.f32.vlgmr.msra.gmra.mrb[4].mxu1 %vm1772_vm10, %v3310_v42 }
 0x5a7   :  { %3400 = vmatprep.mubr.f32.mxu0 %v3664_v2  ;;  %3477 = vmatprep.mubr.f32.mxu1 %v3664_v2 }
 0x5aa   :  { %3569 = vmatmul.mubr.msk.f32.gmra.mrb[6].mxu0 %vm1772_vm10, %v3311_v43  ;;  %3571 = vmatmul.mubr.msk.f32.gmra.mrb[6].mxu1 %vm1772_vm10, %v3311_v43 }
 0x679   :  { %v3396_v45 = vpop.f32.mrb[4].mxu0  ;;  %v3473_v46 = vpop.f32.mrb[4].mxu1 }
 0x67a   :  { %v3397_v47 = vadd.f32 %v3396_v45, %v3317_v44  ;;  %v3474_v48 = vadd.f32 %v3473_v46, %v3317_v44  ;;  %v3398_v49 = vpop.f32.mrb[5].mxu0  ;;  %v3475_v50 = vpop.f32.mrb[5].mxu1 }
 0x67b   :  { %v3399_v51 = vadd.f32 %v3398_v49, %v3317_v44  ;;  %v3476_v52 = vadd.f32 %v3475_v50, %v3317_v44 }
 0x67c   :  { %3484 = vst [vmem:[%s4271_s11] sm:$0xff] %v3397_v47  ;;  %3486 = vst [vmem:[%s4271_s11 + $0x10] sm:$0xff] %v3474_v48 }
 0x67d   :  { %3485 = vst [vmem:[%s4271_s11 + $0x8] sm:$0xff] %v3399_v51  ;;  %3487 = vst [vmem:[%s4271_s11 + $0x18] sm:$0xff] %v3476_v52  ;;  %v3402_v2 = vpop.f32.mrb[6].mxu0  ;;  %v3479_v54 = vpop.f32.mrb[6].mxu1 }
 0x67e   :  { %v3403_v55 = vadd.f32 %v3402_v2, %v3322_v53  ;;  %v3480_v56 = vadd.f32 %v3479_v54, %v3322_v53  ;;  %v3404_v57 = vpop.f32.mrb[7].mxu0  ;;  %v3481_v58 = vpop.f32.mrb[7].mxu1 }
 0x67f   :  { %v3405_v59 = vadd.f32 %v3404_v57, %v3322_v53  ;;  %v3482_v60 = vadd.f32 %v3481_v58, %v3322_v53 }
 0x680   :  { %3488 = vst [vmem:[%s4271_s11 + $0x20] sm:$0xff] %v3403_v55  ;;  %3490 = vst [vmem:[%s4271_s11 + $0x30] sm:$0xff] %v3480_v56 }
 0x681   :  { %3489 = vst [vmem:[%s4271_s11 + $0x28] sm:$0xff] %v3405_v59  ;;  %3491 = vst [vmem:[%s4271_s11 + $0x38] sm:$0xff] %v3482_v60 }

</bundles_post_ra>
